<compile_context>
chip_gen: v7x
topology: tpu7x:2x2x1
jax: 0.10.0
libtpu: 0.0.40
codegen_flags: <defaults>
</compile_context>

<pallas_src>
import jax
import jax.numpy as jnp
from jax.experimental import pallas as pl
from jax.experimental.pallas import tpu as pltpu


def _round_up(n, m):
    return -(-n // m) * m


def _im2col_nchw(x_nchw):
    """(B, C, H, W) f32 -> (B, H*W, 9*C) f32 patch slab (3x3 SAME, tap-major)."""
    B, C, H, W = x_nchw.shape
    x = jnp.transpose(x_nchw, (0, 2, 3, 1)).astype(jnp.float32)   # NHWC
    xp = jnp.pad(x, ((0, 0), (1, 1), (1, 1), (0, 0)))
    taps = [xp[:, di:di + H, dj:dj + W, :]
            for di in range(3) for dj in range(3)]
    patches = jnp.stack(taps, axis=3)                             # (B,H,W,9,C)
    return patches.reshape(B, H * W, 9 * C)


def _forward_kernel(p_ref, pool_ref, wc_ref, bc_ref, w1_ref, b1_ref,
                    w2_ref, b2_ref, out_ref):
    # p_ref:    (1, Bt*HW, KP) bf16  im2col patch slab (K padded with zeros)
    # pool_ref: (Bt, Bt*HW)    bf16  block-diagonal 1/HW pooling matrix
    # wc_ref:   (KP, FP) bf16 ; bc_ref (1, FP) f32
    # w1_ref:   (FP, HP) bf16 ; b1_ref (1, HP) f32
    # w2_ref:   (HP, NCP) bf16; b2_ref (1, NCP) f32
    # out_ref:  (1, Bt, NCP) f32
    patches = p_ref[0]                                        # (Bt*HW, KP)

    # --- synthetic backbone: 3x3 SAME conv as ONE fused K=KP MXU matmul -----
    feat = jnp.dot(patches, wc_ref[...],
                   preferred_element_type=jnp.float32)        # (Bt*HW, FP)
    feat = jnp.maximum(feat + bc_ref[...], 0.0)

    # --- global average pool on the MXU (bf16 operands, f32 accumulation) ---
    pooled = jnp.dot(pool_ref[...], feat.astype(jnp.bfloat16),
                     preferred_element_type=jnp.float32)      # (Bt, FP)

    # --- head_cls: Linear -> ReLU -> Dropout(0.5) -> Linear ------------------
    # TODO(synk): Dropout(0.5) is identity at inference; training-mode
    # stochastic masking (and 1/p scaling) is not implemented here.
    h = jnp.dot(pooled.astype(jnp.bfloat16), w1_ref[...],
                preferred_element_type=jnp.float32)
    h = jnp.maximum(h + b1_ref[...], 0.0)                     # (Bt, HP)
    out = jnp.dot(h.astype(jnp.bfloat16), w2_ref[...],
                  preferred_element_type=jnp.float32) + b2_ref[...]
    out_ref[...] = out.reshape(out_ref.shape)                 # (1, Bt, NCP)


def basic_model_cls_forward(x_nchw, params, *, batch_splits=None):
    """x_nchw: (B, C, H, W) float32 (PyTorch layout). Returns (B, num_classes)."""
    B, C, H, W = x_nchw.shape
    HW = H * W
    F = params['wc'].shape[2]
    hidden = params['w1'].shape[1]
    num_classes = params['w2'].shape[1]

    KP = _round_up(9 * C, 32)          # conv K (9*C=27 -> 32)
    FP = _round_up(F, 128)             # backbone feature lanes
    HP = _round_up(hidden, 128)        # head hidden lanes
    NCP = _round_up(num_classes, 128)  # output lanes (unmasked vst)

    # Per-core batch split: on v7x each TensorCore gets one batched step; on
    # single-TC v5e/v6e the G serial steps are ~0.35 us each (batch_splits=1
    # folds everything into a single step there).
    G = min(2, B) if batch_splits is None else batch_splits
    B_pad = _round_up(B, G)
    Bt = B_pad // G
    M = Bt * HW

    # ---- wrapper-side layout prep (tiny at these shapes) -------------------
    patches = _im2col_nchw(x_nchw)                               # (B,HW,9C) f32
    patches = jnp.pad(patches,
                      ((0, B_pad - B), (0, 0), (0, KP - 9 * C)))
    patches = patches.reshape(G, M, KP).astype(jnp.bfloat16)     # bf16 once

    # Block-diagonal pooling matrix: row b has 1/HW over columns [b*HW,(b+1)*HW).
    # 1/HW is exact in bf16 for power-of-two HW (HW=256 here).
    pool = (jnp.repeat(jnp.eye(Bt, dtype=jnp.float32), HW, axis=1)
            * (1.0 / HW)).astype(jnp.bfloat16)                   # (Bt, M)

    def pad2(a, r, c):
        return jnp.pad(a, ((0, r - a.shape[0]), (0, c - a.shape[1])))

    wc = pad2(params['wc'].reshape(9 * C, F), KP, FP).astype(jnp.bfloat16)
    bc = pad2(params['bc'], 1, FP)                               # f32
    w1 = pad2(params['w1'], FP, HP).astype(jnp.bfloat16)
    b1 = pad2(params['b1'], 1, HP)                               # f32
    w2 = pad2(params['w2'], HP, NCP).astype(jnp.bfloat16)
    b2 = pad2(params['b2'], 1, NCP)                              # f32

    flops = G * (2 * M * KP * FP            # fused conv matmul
                 + 2 * Bt * M * FP          # pool (MXU)
                 + 2 * Bt * FP * HP         # head Linear 1
                 + 2 * Bt * HP * NCP)       # head Linear 2
    bytes_accessed = (patches.size * 2 + pool.size * 2 + wc.size * 2
                      + bc.size * 4 + w1.size * 2 + b1.size * 4
                      + w2.size * 2 + b2.size * 4 + G * Bt * NCP * 4)

    out = pl.pallas_call(
        _forward_kernel,
        out_shape=jax.ShapeDtypeStruct((G, Bt, NCP), jnp.float32),
        grid=(G,),
        in_specs=[
            pl.BlockSpec((1, M, KP), lambda g: (g, 0, 0)),       # patches
            pl.BlockSpec((Bt, M), lambda g: (0, 0)),             # pool matrix
            pl.BlockSpec((KP, FP), lambda g: (0, 0)),            # conv W
            pl.BlockSpec((1, FP), lambda g: (0, 0)),             # conv b
            pl.BlockSpec((FP, HP), lambda g: (0, 0)),            # head W1
            pl.BlockSpec((1, HP), lambda g: (0, 0)),             # head b1
            pl.BlockSpec((HP, NCP), lambda g: (0, 0)),           # head W2
            pl.BlockSpec((1, NCP), lambda g: (0, 0)),            # head b2
        ],
        out_specs=pl.BlockSpec((1, Bt, NCP), lambda g: (g, 0, 0)),
        compiler_params=pltpu.CompilerParams(
            dimension_semantics=("parallel",)),
        cost_estimate=pl.CostEstimate(flops=flops, transcendentals=0,
                                      bytes_accessed=bytes_accessed),
    )(patches, pool, wc, bc, w1, b1, w2, b2)
    # TODO(synk): for real ResNeSt-sized H*W, add an "arbitrary" spatial-row
    # grid axis with a persistent pooled accumulator and size the row tile
    # against v7x's 64 MiB VMEM (with double-buffering counted); unnecessary
    # at these toy shapes.
    return out.reshape(B_pad, NCP)[:B, :num_classes]


def _reference_forward(x_nchw, params):
    """Plain-JAX reference mirroring the kernel's bf16-operand / f32-accum math."""
    B, C, H, W = x_nchw.shape
    HW = H * W
    F = params['wc'].shape[2]

    def r(a):  # round to bf16 (what the MXU consumes), back to f32
        return a.astype(jnp.bfloat16).astype(jnp.float32)

    patches = _im2col_nchw(x_nchw)                               # (B, HW, 9C)
    wc = params['wc'].reshape(9 * C, F)
    feat = jnp.einsum('bpk,kf->bpf', r(patches), r(wc))          # f32 accum
    feat = jnp.maximum(feat + params['bc'][0], 0.0)
    inv_hw = jnp.asarray(1.0 / HW, jnp.bfloat16).astype(jnp.float32)
    pooled = jnp.sum(r(feat) * inv_hw, axis=1)
    h = jnp.maximum(r(pooled) @ r(params['w1']) + params['b1'][0], 0.0)
    return r(h) @ r(params['w2']) + params['b2'][0]


def _init_params(key, c_in, in_features, hidden, num_classes):
    """Deterministic synthetic parameters (the module __init__ fixes head shapes)."""
    k = jax.random.split(key, 6)
    s = 0.05
    return {
        # synthetic backbone 3x3 conv, stored as (9, C_in, in_features)
        'wc': s * jax.random.normal(k[0], (9, c_in, in_features), jnp.float32),
        'bc': s * jax.random.normal(k[1], (1, in_features), jnp.float32),
        # head Linear(in_features -> hidden)
        'w1': s * jax.random.normal(k[2], (in_features, hidden), jnp.float32),
        'b1': s * jax.random.normal(k[3], (1, hidden), jnp.float32),
        # final Linear(hidden -> num_classes)
        'w2': s * jax.random.normal(k[4], (hidden, num_classes), jnp.float32),
        'b2': s * jax.random.normal(k[5], (1, num_classes), jnp.float32),
    }


if __name__ == "__main__":
    key = jax.random.PRNGKey(0)
    kx, kp = jax.random.split(key)

    # RGB image in, 5-class cassava head out; dims_head = [in_features=32, 64, 5].
    B, C, H, W = 2, 3, 16, 16
    in_features, hidden, num_classes = 32, 64, 5

    x = jax.random.normal(kx, (B, C, H, W), jnp.float32)     # NCHW, like PyTorch
    params = _init_params(kp, C, in_features, hidden, num_classes)

    out = basic_model_cls_forward(x, params)
    out = jax.block_until_ready(out)
    ref = _reference_forward(x, params)

    assert out.shape == (B, num_classes)
    assert jnp.allclose(out, ref, atol=1e-2, rtol=1e-2), "mismatch vs reference"
    print("KERNEL_OK")
</pallas_src>

<mosaic_0001>
module attributes {stable_mosaic.version = 11 : i64} {
  func.func @_forward_kernel(%arg0: i32, %arg1: memref<1x256x32xbf16, #tpu.memory_space<vmem>>, %arg2: memref<1x256xbf16, #tpu.memory_space<vmem>>, %arg3: memref<32x128xbf16, #tpu.memory_space<vmem>>, %arg4: memref<1x128xf32, #tpu.memory_space<vmem>>, %arg5: memref<128x128xbf16, #tpu.memory_space<vmem>>, %arg6: memref<1x128xf32, #tpu.memory_space<vmem>>, %arg7: memref<128x128xbf16, #tpu.memory_space<vmem>>, %arg8: memref<1x128xf32, #tpu.memory_space<vmem>>, %arg9: memref<1x1x128xf32, #tpu.memory_space<vmem>>) attributes {dimension_semantics = [#tpu.dimension_semantics<parallel>], iteration_bounds = array<i64: 2>, scalar_prefetch = 0 : i64, scratch_operands = 0 : i64, tpu.core_type = #tpu.core_type<tc>, window_params = [{transform_indices = @transform_0, window_bounds = array<i64: 1, 256, 32>}, {pipeline_mode = #tpu.pipeline_mode<synchronous>, transform_indices = @transform_1, window_bounds = array<i64: 1, 256>}, {pipeline_mode = #tpu.pipeline_mode<synchronous>, transform_indices = @transform_2, window_bounds = array<i64: 32, 128>}, {pipeline_mode = #tpu.pipeline_mode<synchronous>, transform_indices = @transform_3, window_bounds = array<i64: 1, 128>}, {pipeline_mode = #tpu.pipeline_mode<synchronous>, transform_indices = @transform_4, window_bounds = array<i64: 128, 128>}, {pipeline_mode = #tpu.pipeline_mode<synchronous>, transform_indices = @transform_5, window_bounds = array<i64: 1, 128>}, {pipeline_mode = #tpu.pipeline_mode<synchronous>, transform_indices = @transform_6, window_bounds = array<i64: 128, 128>}, {pipeline_mode = #tpu.pipeline_mode<synchronous>, transform_indices = @transform_7, window_bounds = array<i64: 1, 128>}, {transform_indices = @transform_8, window_bounds = array<i64: 1, 1, 128>}]} {
    %c0 = arith.constant 0 : index
    %c0_0 = arith.constant 0 : index
    %c0_1 = arith.constant 0 : index
    %0 = vector.load %arg1[%c0, %c0_0, %c0_1] : memref<1x256x32xbf16, #tpu.memory_space<vmem>>, vector<1x256x32xbf16>
    %1 = vector.shape_cast %0 : vector<1x256x32xbf16> to vector<256x32xbf16>
    %c0_2 = arith.constant 0 : index
    %c0_3 = arith.constant 0 : index
    %2 = vector.load %arg3[%c0_2, %c0_3] : memref<32x128xbf16, #tpu.memory_space<vmem>>, vector<32x128xbf16>
    %cst = arith.constant dense<0.000000e+00> : vector<256x128xf32>
    %3 = tpu.matmul %1, %2, %cst {dimension_numbers = #tpu.dot_dimension_numbers<[1], [0], [0], [1], [0, 0, 1, 1], [], []>} : vector<256x32xbf16>, vector<32x128xbf16>, vector<256x128xf32> -> vector<256x128xf32>
    %c0_4 = arith.constant 0 : index
    %c0_5 = arith.constant 0 : index
    %4 = vector.load %arg4[%c0_4, %c0_5] : memref<1x128xf32, #tpu.memory_space<vmem>>, vector<1x128xf32>
    %5 = vector.broadcast %4 : vector<1x128xf32> to vector<256x128xf32>
    %6 = arith.addf %3, %5 : vector<256x128xf32>
    %cst_6 = arith.constant 0.000000e+00 : f32
    %7 = vector.broadcast %cst_6 : f32 to vector<256x128xf32>
    %8 = arith.maximumf %6, %7 : vector<256x128xf32>
    %c0_7 = arith.constant 0 : index
    %c0_8 = arith.constant 0 : index
    %9 = vector.load %arg2[%c0_7, %c0_8] : memref<1x256xbf16, #tpu.memory_space<vmem>>, vector<1x256xbf16>
    %10 = arith.truncf %8 : vector<256x128xf32> to vector<256x128xbf16>
    %cst_9 = arith.constant dense<0.000000e+00> : vector<1x128xf32>
    %11 = tpu.matmul %9, %10, %cst_9 {dimension_numbers = #tpu.dot_dimension_numbers<[1], [0], [0], [1], [0, 0, 1, 1], [], []>} : vector<1x256xbf16>, vector<256x128xbf16>, vector<1x128xf32> -> vector<1x128xf32>
    %12 = arith.truncf %11 : vector<1x128xf32> to vector<1x128xbf16>
    %c0_10 = arith.constant 0 : index
    %c0_11 = arith.constant 0 : index
    %13 = vector.load %arg5[%c0_10, %c0_11] : memref<128x128xbf16, #tpu.memory_space<vmem>>, vector<128x128xbf16>
    %cst_12 = arith.constant dense<0.000000e+00> : vector<1x128xf32>
    %14 = tpu.matmul %12, %13, %cst_12 {dimension_numbers = #tpu.dot_dimension_numbers<[1], [0], [0], [1], [0, 0, 1, 1], [], []>} : vector<1x128xbf16>, vector<128x128xbf16>, vector<1x128xf32> -> vector<1x128xf32>
    %c0_13 = arith.constant 0 : index
    %c0_14 = arith.constant 0 : index
    %15 = vector.load %arg6[%c0_13, %c0_14] : memref<1x128xf32, #tpu.memory_space<vmem>>, vector<1x128xf32>
    %16 = arith.addf %14, %15 : vector<1x128xf32>
    %cst_15 = arith.constant 0.000000e+00 : f32
    %17 = vector.broadcast %cst_15 : f32 to vector<1x128xf32>
    %18 = arith.maximumf %16, %17 : vector<1x128xf32>
    %19 = arith.truncf %18 : vector<1x128xf32> to vector<1x128xbf16>
    %c0_16 = arith.constant 0 : index
    %c0_17 = arith.constant 0 : index
    %20 = vector.load %arg7[%c0_16, %c0_17] : memref<128x128xbf16, #tpu.memory_space<vmem>>, vector<128x128xbf16>
    %cst_18 = arith.constant dense<0.000000e+00> : vector<1x128xf32>
    %21 = tpu.matmul %19, %20, %cst_18 {dimension_numbers = #tpu.dot_dimension_numbers<[1], [0], [0], [1], [0, 0, 1, 1], [], []>} : vector<1x128xbf16>, vector<128x128xbf16>, vector<1x128xf32> -> vector<1x128xf32>
    %c0_19 = arith.constant 0 : index
    %c0_20 = arith.constant 0 : index
    %22 = vector.load %arg8[%c0_19, %c0_20] : memref<1x128xf32, #tpu.memory_space<vmem>>, vector<1x128xf32>
    %23 = arith.addf %21, %22 : vector<1x128xf32>
    %24 = vector.shape_cast %23 : vector<1x128xf32> to vector<1x1x128xf32>
    %c0_21 = arith.constant 0 : index
    %c0_22 = arith.constant 0 : index
    %c0_23 = arith.constant 0 : index
    %25 = vector.load %arg9[%c0_21, %c0_22, %c0_23] : memref<1x1x128xf32, #tpu.memory_space<vmem>>, vector<1x1x128xf32>
    tpu.vector_store %arg9[%c0_21, %c0_22, %c0_23], %24 {strides = array<i32>} : memref<1x1x128xf32, #tpu.memory_space<vmem>>, vector<1x1x128xf32>,
    return
  }
  func.func @transform_0(%arg0: i32) -> (i32, i32, i32) {
    %c0_i32 = arith.constant 0 : i32
    %c0_i32_0 = arith.constant 0 : i32
    %c0_i32_1 = arith.constant 0 : i32
    return %arg0, %c0_i32, %c0_i32_0 : i32, i32, i32
  }
  func.func @transform_1(%arg0: i32) -> (i32, i32) {
    %c0_i32 = arith.constant 0 : i32
    %c0_i32_0 = arith.constant 0 : i32
    %c0_i32_1 = arith.constant 0 : i32
    return %c0_i32, %c0_i32_0 : i32, i32
  }
  func.func @transform_2(%arg0: i32) -> (i32, i32) {
    %c0_i32 = arith.constant 0 : i32
    %c0_i32_0 = arith.constant 0 : i32
    %c0_i32_1 = arith.constant 0 : i32
    return %c0_i32, %c0_i32_0 : i32, i32
  }
  func.func @transform_3(%arg0: i32) -> (i32, i32) {
    %c0_i32 = arith.constant 0 : i32
    %c0_i32_0 = arith.constant 0 : i32
    %c0_i32_1 = arith.constant 0 : i32
    return %c0_i32, %c0_i32_0 : i32, i32
  }
  func.func @transform_4(%arg0: i32) -> (i32, i32) {
    %c0_i32 = arith.constant 0 : i32
    %c0_i32_0 = arith.constant 0 : i32
    %c0_i32_1 = arith.constant 0 : i32
    return %c0_i32, %c0_i32_0 : i32, i32
  }
  func.func @transform_5(%arg0: i32) -> (i32, i32) {
    %c0_i32 = arith.constant 0 : i32
    %c0_i32_0 = arith.constant 0 : i32
    %c0_i32_1 = arith.constant 0 : i32
    return %c0_i32, %c0_i32_0 : i32, i32
  }
  func.func @transform_6(%arg0: i32) -> (i32, i32) {
    %c0_i32 = arith.constant 0 : i32
    %c0_i32_0 = arith.constant 0 : i32
    %c0_i32_1 = arith.constant 0 : i32
    return %c0_i32, %c0_i32_0 : i32, i32
  }
  func.func @transform_7(%arg0: i32) -> (i32, i32) {
    %c0_i32 = arith.constant 0 : i32
    %c0_i32_0 = arith.constant 0 : i32
    %c0_i32_1 = arith.constant 0 : i32
    return %c0_i32, %c0_i32_0 : i32, i32
  }
  func.func @transform_8(%arg0: i32) -> (i32, i32, i32) {
    %c0_i32 = arith.constant 0 : i32
    %c0_i32_0 = arith.constant 0 : i32
    %c0_i32_1 = arith.constant 0 : i32
    return %arg0, %c0_i32, %c0_i32_0 : i32, i32, i32
  }
}

</mosaic_0001>

<bundles_post_ra>
// kernel: tpu_custom_call.1
= control target key start
LH: loop header
LB: loop body
LE: loop exit
PB: predicated region body
PF: predicated region fallthrough
CT: control target
= control target key end

     0   :  { %13 = vsyncpa [#allocation3], 0  ;;  %s1718_s0 = inlined_call_operand.vmem [shape: bf16[2,256,32], index: 0, kind: input, shape index: {}]   ;;  %s1719_s1 = inlined_call_operand.vmem [shape: bf16[1,256], index: 1, kind: input, shape index: {}]   ;;  %s1720_s2 = inlined_call_operand.vmem [shape: bf16[32,128], index: 2, kind: input, shape index: {}]   ;;  %s1721_s3 = inlined_call_operand.vmem [shape: f32[1,128], index: 3, kind: input, shape index: {}]   ;;  %s1722_s4 = inlined_call_operand.vmem [shape: bf16[128,128], index: 4, kind: input, shape index: {}]   ;;  %s1723_s5 = inlined_call_operand.vmem [shape: f32[1,128], index: 5, kind: input, shape index: {}]   ;;  %s1724_s6 = inlined_call_operand.vmem [shape: bf16[128,128], index: 6, kind: input, shape index: {}]   ;;  %s1725_s7 = inlined_call_operand.vmem [shape: f32[1,128], index: 7, kind: input, shape index: {}]   ;;  %s1726_s8 = inlined_call_operand.hbm [shape: f32[2,1,128], index: 8, kind: output, shape index: {}]  }
   0x1   :  { %15 = vsyncpa [#allocation3 + $0x1], 0  ;;  %s1430_s27 = smov 0   ;;  %s1432_s28 = smov 0  }
   0x2   :  { %s1434_s29 = smov 0   ;;  %s1436_s30 = smov 0  }
   0x3 LB: > { %s1451_s9 = sadd.s32 4294967295, %s1379_s30   ;;  %s1045_s10 = sadd.s32 4294967294, %s1379_s30   ;;  %s1379_s30 = sphi %s1436_s30, %s1732_s30   ;;  %s1375_s29 = sphi %s1434_s29, %s1731_s29   ;;  %s1371_s28 = sphi %s1432_s28, %s1730_s28   ;;  %s1367_s27 = sphi %s1430_s27, %s1729_s27  }
   0x4   : > { %s1455_s11 = sadd.s32 1, %s1379_s30   ;;  %s201_s12 = sadd.s32 1, %s1375_s29 }
   0x5   : > { %s198_s13 = ssub.s32 %s1379_s30, %s1455_s11  ;;  %p211_p0 = scmp.ne.s32.totalorder %s1375_s29, %s1371_s28 }
   0x6   : > { %p199_p1 = scmp.eq.s32.totalorder %s198_s13, 0  ;;  %p212_p2 = scmp.eq.s32.totalorder %s1451_s9, 1 }
   0x7   : > { %p217_p3 = scmp.ne.s32.totalorder %s1371_s28, %s1367_s27  ;;  %p218_p4 = scmp.eq.s32.totalorder %s1045_s10, 1 }
   0x8   : > { %s1466_s14 = scalar_select %p199_p1, %s1375_s29, %s201_s12  }
   0x9   : > { %p1468_p5 = por %p212_p2, %p211_p0  ;;  %p1472_p6 = por %p218_p4, %p217_p3 }
   0xa   : > { %p1048_p7 = scmp.ge.s32.totalorder %s1379_s30, 1  ;;  %p265_p8 = scmp.lt.s32.totalorder %s1379_s30, 3 }
   0xc   : > { %p266_p9 = pnand %p1048_p7, %p265_p8 }
   0xd   : > { %v1283_v0 = vld [vmem:[%s1720_s2] sm:$0xff] (!%p266_p9)   ;;  %p298_p10 = scmp.lt.s32.totalorder (!%p266_p9), %s1451_s9, 1  ;;  %v1284_v1 = vld [vmem:[%s1720_s2 + $0x8] sm:$0xff] (!%p266_p9)   ;;  %vm439_vm0 = vcmask (!%p266_p9), 261120   ;;  %v1381_v18 = vmov (!%p266_p9), 1966171168   ;;  %v710_v20 = vlaneseq (!%p266_p9) }
   0xe   : > { %269 = sbr.rel (%p266_p9) target bundleno = 975 (0x3cf), region = 52  ;;  %1165 = vmatprep.subr.bf16.mxu0 (!%p266_p9), %v1283_v0  ;;  %v708_v19 = vunpack.c.l.s4 (!%p266_p9), %v1381_v18  ;;  %v1526_v23 = vld.sshfl [vmem:[%s1719_s1] sm:$0x11 pattern:$0x75316420] (!%p266_p9)  ;;  %v1382_v28 = vmov (!%p266_p9), 0.0  }
   0xf   : > { %1166 = vmatpush3.bf16.msra.mxu0 (!%p266_p9), %v1283_v0  ;;  %v711_v22 = vshrl.u32 (!%p266_p9), %v710_v20, 7  ;;  %v706_v24 = vcombine.high (!%p266_p9), %v1526_v23, %v1526_v23  ;;  %v1539_v29 = vld [vmem:[%s1721_s3] ss:$0 sm:$0xff] (!%p266_p9)  ;;  %vm1383_vm1 = vmmov (!%p266_p9), 0   ;;  %s1103_s12 = sshll.u32 (!%p266_p9), %s1451_s9, 4 }
  0x10   : > { %1167 = vmatprep.subr.bf16.mxu0 (!%p266_p9), %v1284_v1  ;;  %v709_v21 = vunpack.c.0.s8 (!%p266_p9), %v708_v19  ;;  %s1676_s20 = scalar_lea.hbm (!%p266_p9), %s1726_s8, %s1103_s12 }
  0x12   : > { %v1530_v25 = vsub.s32 (!%p266_p9), %v709_v21, %v711_v22 }
  0x13   : > { %1168 = vmatpush3.bf16.msra.mxu0 (!%p266_p9), %v1284_v1 }
  0x14   : > { %v720_v26 = vrot.slane (!%p266_p9), %v706_v24, %v1530_v25  ;;  %v713_v27 = vrot.slane (!%p266_p9), %v1526_v23, %v1530_v25  ;;  %1221 = vmatprep.subr.bf16.mxu0 (!%p266_p9), %v1382_v28  ;;  %v1304_v23 = vld [vmem:[%s1722_s4 + $0x18] sm:$0xff] (!%p266_p9)   ;;  %v1305_v25 = vld [vmem:[%s1722_s4 + $0x20] sm:$0xff] (!%p266_p9)  }
  0x15   : > { %s299_s21 = scalar_select %p298_p10, %s1451_s9, 1 }
  0x16   : > { %755 = vmatprep.mubr.bf16.mxu1 %v720_v26 }
  0x17   : > { %s1106_s22 = sshll.u32 %s299_s21, 7 }
  0x18   : > { %s1489_s25 = scalar_lea.vmem %s1718_s0, %s1106_s22  ;;  %s1384_s22 = smov [#allocation2]  }
  0x19   : > { %v1285_v2 = vld [vmem:[%s1489_s25] sm:$0xff]   ;;  %v1286_v3 = vld [vmem:[%s1489_s25 + $0x8] sm:$0xff]   ;;  %v1287_v4 = vld [vmem:[%s1489_s25 + $0x10] sm:$0xff]   ;;  %s1321_s23 = sshll.u32 %s1384_s22, 4  ;;  %s1322_s23 = int_to_ptr.vmem [resolvable:$false] %s1321_s23 }
  0x1a   : > { %1169 = vmatprep.mubr.msk.bf16.mxu0 %vm439_vm0, %v1285_v2  ;;  %v1288_v5 = vld [vmem:[%s1489_s25 + $0x18] sm:$0xff]   ;;  %v1289_v6 = vld [vmem:[%s1489_s25 + $0x20] sm:$0xff]   ;;  %v1290_v7 = vld [vmem:[%s1489_s25 + $0x28] sm:$0xff]   ;;  %s1323_s24 = scalar_lea.vmem %s1322_s23, 32 }
  0x1b   : > { %1170 = vmatmul.mubr.msk.bf16.vlgmr.msra.gmra.mrb[0].mxu0 %vm439_vm0, %v1286_v3  ;;  %v1291_v8 = vld [vmem:[%s1489_s25 + $0x30] sm:$0xff]   ;;  %v1292_v9 = vld [vmem:[%s1489_s25 + $0x38] sm:$0xff]   ;;  %v1293_v10 = vld [vmem:[%s1489_s25 + $0x40] sm:$0xff]  }
  0x1c   : > { %1173 = vmatprep.mubr.msk.bf16.mxu0 %vm439_vm0, %v1287_v4  ;;  %v1294_v11 = vld [vmem:[%s1489_s25 + $0x48] sm:$0xff]   ;;  %v1295_v12 = vld [vmem:[%s1489_s25 + $0x50] sm:$0xff]   ;;  %v1296_v13 = vld [vmem:[%s1489_s25 + $0x58] sm:$0xff]  }
  0x1d   : > { %v1297_v14 = vld [vmem:[%s1489_s25 + $0x60] sm:$0xff]   ;;  %v1298_v15 = vld [vmem:[%s1489_s25 + $0x68] sm:$0xff]   ;;  %v1299_v16 = vld [vmem:[%s1489_s25 + $0x70] sm:$0xff]  }
  0x1e   : > { %v1300_v17 = vld [vmem:[%s1489_s25 + $0x78] sm:$0xff]   ;;  %s296_s25 = sand.u32 1, %s1371_s28  }
  0x1f   : > { %s297_s13 = scalar_lea.vmem [#allocation2], %s296_s25  ;;  %s978_s21 = scalar_lea.sflag [#allocation3], %s296_s25 }
  0x20   : > { %s990_s17 = sshll.u32 %s297_s13, 4  ;;  %s1678_s17 = int_to_ptr.vmem [resolvable:$true] %s990_s17 }
  0x21   : > { %s1317_s9 = scalar_lea.vmem %s1678_s17, 16  ;;  %p1324_p0 = scmp.lt.s32.totalorder %s1678_s17, %s1322_s23 }
  0x22   : > { %p1318_p11 = scmp.ne.s32.totalorder %s1678_s17, %s1317_s9  ;;  %p1325_p1 = scmp.lt.s32.totalorder %s1323_s24, %s1317_s9 }
  0x23   : > { %1174 = vmatmul.mubr.msk.bf16.gmra.mrb[4].mxu0 %vm439_vm0, %v1288_v5 }
  0x24   : > { %1177 = vmatprep.mubr.msk.bf16.mxu0 %vm439_vm0, %v1289_v6  ;;  %p1319_p12 = pnand %p1318_p11, %p1468_p5  ;;  %p1326_p2 = por %p1325_p1, %p1324_p0 }
  0x26   : > { %p1320_p13 = pneg %p1319_p12 }
  0x28   : > { %p1327_p3 = pnand %p1326_p2, %p1320_p13 }
  0x2b   : > { %1178 = vmatmul.mubr.msk.bf16.gmra.mrb[8].mxu0 %vm439_vm0, %v1290_v7 }
  0x2c   : > { %1181 = vmatprep.mubr.msk.bf16.mxu0 %vm439_vm0, %v1291_v8 }
  0x33   : > { %1182 = vmatmul.mubr.msk.bf16.gmra.mrb[12].mxu0 %vm439_vm0, %v1292_v9 }
  0x34   : > { %1185 = vmatprep.mubr.msk.bf16.mxu0 %vm439_vm0, %v1293_v10 }
  0x3b   : > { %1186 = vmatmul.mubr.msk.bf16.gmra.mrb[16].mxu0 %vm439_vm0, %v1294_v11 }
  0x3c   : > { %1189 = vmatprep.mubr.msk.bf16.mxu0 %vm439_vm0, %v1295_v12 }
  0x43   : > { %1190 = vmatmul.mubr.msk.bf16.gmra.mrb[20].mxu0 %vm439_vm0, %v1296_v13 }
  0x44   : > { %1193 = vmatprep.mubr.msk.bf16.mxu0 %vm439_vm0, %v1297_v14 }
  0x4b   : > { %1194 = vmatmul.mubr.msk.bf16.gmra.mrb[24].mxu0 %vm439_vm0, %v1298_v15 }
  0x4c   : > { %1197 = vmatprep.mubr.msk.bf16.mxu0 %vm439_vm0, %v1299_v16 }
  0x53   : > { %1198 = vmatmul.mubr.msk.bf16.gmra.mrb[28].mxu0 %vm439_vm0, %v1300_v17 }
  0x54   : > { %1237 = vmatprep.mubr.msk.bf16.mxu0 %vm1383_vm1, %v1382_v28 }
  0xee   : > { %v1171_v30 = vpop.f32.mrb[0].mxu0 }
  0xef   : > { %v531_v31 = vadd.f32 %v1171_v30, %v1539_v29  ;;  %v522_v32 = vpop.f32.mrb[1].mxu0 }
  0xf0   : > { %v523_v33 = vadd.f32 %v1539_v29, %v522_v32  ;;  %v1172_v34 = vpop.f32.mrb[2].mxu0 }
  0xf1   : > { %v534_v35 = vadd.f32 %v1172_v34, %v1539_v29  ;;  %v525_v36 = vpop.f32.mrb[3].mxu0  ;;  %v651_v38 = vmax.f32 %v531_v31, 0.0 }
  0xf2   : > { %v526_v37 = vadd.f32 %v1539_v29, %v525_v36  ;;  %v649_v40 = vmax.f32 %v523_v33, 0.0 }
  0xf3   : > { %v652_v39 = vmax.f32 %v534_v35, 0.0 }
  0xf4   : > { %v650_v41 = vmax.f32 %v526_v37, 0.0 }
  0xf5   : > { %v1545_v42 = vpack.c.bf16 %v652_v39, %v651_v38 }
  0xf6   : > { %v1175_v43 = vpop.f32.mrb[4].mxu0  ;;  %v1547_v44 = vpack.c.bf16 %v650_v41, %v649_v40 }
  0xf7   : > { %v547_v45 = vadd.f32 %v1175_v43, %v1539_v29  ;;  %v538_v46 = vpop.f32.mrb[5].mxu0 }
  0xf8   : > { %v539_v47 = vadd.f32 %v1539_v29, %v538_v46  ;;  %v1176_v48 = vpop.f32.mrb[6].mxu0 }
  0xf9   : > { %v550_v49 = vadd.f32 %v1176_v48, %v1539_v29  ;;  %v541_v50 = vpop.f32.mrb[7].mxu0  ;;  %v655_v52 = vmax.f32 %v547_v45, 0.0 }
  0xfa   : > { %v542_v51 = vadd.f32 %v1539_v29, %v541_v50  ;;  %v653_v54 = vmax.f32 %v539_v47, 0.0 }
  0xfb   : > { %v656_v53 = vmax.f32 %v550_v49, 0.0 }
  0xfc   : > { %v654_v55 = vmax.f32 %v542_v51, 0.0 }
  0xfd   : > { %v1553_v56 = vpack.c.bf16 %v656_v53, %v655_v52 }
  0xfe   : > { %v1555_v57 = vpack.c.bf16 %v654_v55, %v653_v54  ;;  %v1179_v58 = vpop.f32.mrb[8].mxu0 }
  0xff   : > { %v563_v59 = vadd.f32 %v1179_v58, %v1539_v29  ;;  %v554_v60 = vpop.f32.mrb[9].mxu0 }
 0x100   : > { %v555_v61 = vadd.f32 %v1539_v29, %v554_v60  ;;  %v1180_v62 = vpop.f32.mrb[10].mxu0 }
 0x101   : > { %v566_v63 = vadd.f32 %v1180_v62, %v1539_v29  ;;  %v557_v0 = vpop.f32.mrb[11].mxu0  ;;  %v659_v2 = vmax.f32 %v563_v59, 0.0 }
 0x102   : > { %v558_v1 = vadd.f32 %v1539_v29, %v557_v0  ;;  %v657_v4 = vmax.f32 %v555_v61, 0.0 }
 0x103   : > { %v660_v3 = vmax.f32 %v566_v63, 0.0 }
 0x104   : > { %v658_v5 = vmax.f32 %v558_v1, 0.0 }
 0x105   : > { %v1561_v6 = vpack.c.bf16 %v660_v3, %v659_v2 }
 0x106   : > { %v1563_v7 = vpack.c.bf16 %v658_v5, %v657_v4  ;;  %v1183_v8 = vpop.f32.mrb[12].mxu0 }
 0x107   : > { %v579_v9 = vadd.f32 %v1183_v8, %v1539_v29  ;;  %v570_v10 = vpop.f32.mrb[13].mxu0 }
 0x108   : > { %v571_v11 = vadd.f32 %v1539_v29, %v570_v10  ;;  %v1184_v12 = vpop.f32.mrb[14].mxu0 }
 0x109   : > { %v582_v13 = vadd.f32 %v1184_v12, %v1539_v29  ;;  %v573_v14 = vpop.f32.mrb[15].mxu0  ;;  %v663_v16 = vmax.f32 %v579_v9, 0.0 }
 0x10a   : > { %v574_v15 = vadd.f32 %v1539_v29, %v573_v14  ;;  %v661_v18 = vmax.f32 %v571_v11, 0.0 }
 0x10b   : > { %v664_v17 = vmax.f32 %v582_v13, 0.0 }
 0x10c   : > { %v662_v19 = vmax.f32 %v574_v15, 0.0 }
 0x10d   : > { %v1569_v20 = vpack.c.bf16 %v664_v17, %v663_v16 }
 0x10e   : > { %v1571_v21 = vpack.c.bf16 %v662_v19, %v661_v18  ;;  %v1187_v22 = vpop.f32.mrb[16].mxu0 }
 0x10f   : > { %v595_v24 = vadd.f32 %v1187_v22, %v1539_v29  ;;  %v586_v26 = vpop.f32.mrb[17].mxu0 }
 0x110   : > { %v587_v30 = vadd.f32 %v1539_v29, %v586_v26  ;;  %v1188_v31 = vpop.f32.mrb[18].mxu0  ;;  %v1310_v26 = vld [vmem:[%s1724_s6 + $0x8] sm:$0xff]  }
 0x111   : > { %v598_v32 = vadd.f32 %v1188_v31, %v1539_v29  ;;  %v589_v33 = vpop.f32.mrb[19].mxu0  ;;  %v667_v35 = vmax.f32 %v595_v24, 0.0  ;;  %v1309_v24 = vld [vmem:[%s1724_s6] sm:$0xff]   ;;  %v1312_v31 = vld [vmem:[%s1724_s6 + $0x18] sm:$0xff]  }
 0x112   : > { %v590_v34 = vadd.f32 %v1539_v29, %v589_v33  ;;  %v665_v37 = vmax.f32 %v587_v30, 0.0  ;;  %1222 = vmatpush3.bf16.msra.mxu0 %v1309_v24  ;;  %v1311_v30 = vld [vmem:[%s1724_s6 + $0x10] sm:$0xff]   ;;  %v1314_v33 = vld [vmem:[%s1724_s6 + $0x28] sm:$0xff]  }
 0x113   : > { %v668_v36 = vmax.f32 %v598_v32, 0.0  ;;  %1223 = vmatprep.subr.bf16.mxu0 %v1382_v28  ;;  %v1313_v32 = vld [vmem:[%s1724_s6 + $0x20] sm:$0xff]  }
 0x114   : > { %v666_v38 = vmax.f32 %v590_v34, 0.0  ;;  %v1315_v34 = vld [vmem:[%s1724_s6 + $0x30] sm:$0xff]  }
 0x115   : > { %v691_v39 = vpack.c.bf16 %v668_v36, %v667_v35  ;;  %v1316_v35 = vld [vmem:[%s1724_s6 + $0x38] sm:$0xff]  }
 0x116   : > { %v1191_v40 = vpop.f32.mrb[20].mxu0  ;;  %v690_v41 = vpack.c.bf16 %v666_v38, %v665_v37  ;;  %1224 = vmatpush3.bf16.msra.mxu0 %v1310_v26 }
 0x117   : > { %v611_v43 = vadd.f32 %v1191_v40, %v1539_v29  ;;  %v602_v45 = vpop.f32.mrb[21].mxu0  ;;  %1225 = vmatprep.subr.bf16.mxu0 %v1382_v28 }
 0x118   : > { %v603_v46 = vadd.f32 %v1539_v29, %v602_v45  ;;  %v1192_v47 = vpop.f32.mrb[22].mxu0  ;;  %1125 = vmatprep.subr.bf16.mxu1 %v690_v41 }
 0x119   : > { %v614_v48 = vadd.f32 %v1192_v47, %v1539_v29  ;;  %v605_v49 = vpop.f32.mrb[23].mxu0  ;;  %1126 = vmatpush3.bf16.msra.mxu1 %v1547_v44  ;;  %v671_v51 = vmax.f32 %v611_v43, 0.0  ;;  %v780_v43 = vld [vmem:[%s1723_s5] sm:$0x1] }
 0x11a   : > { %v606_v50 = vadd.f32 %v1539_v29, %v605_v49  ;;  %1127 = vmatprep.subr.bf16.mxu1 %v691_v39  ;;  %v669_v53 = vmax.f32 %v603_v46, 0.0  ;;  %1226 = vmatpush3.bf16.msra.mxu0 %v1311_v30 }
 0x11b   : > { %v672_v52 = vmax.f32 %v614_v48, 0.0  ;;  %1227 = vmatprep.subr.bf16.mxu0 %v1382_v28 }
 0x11c   : > { %v670_v54 = vmax.f32 %v606_v50, 0.0 }
 0x11d   : > { %v693_v55 = vpack.c.bf16 %v672_v52, %v671_v51  ;;  %1128 = vmatpush3.bf16.msra.mxu1 %v1545_v42  ;;  %v887_v51 = vld [vmem:[%s1725_s7] sm:$0x1] }
 0x11e   : > { %v692_v58 = vpack.c.bf16 %v670_v54, %v669_v53  ;;  %v1195_v59 = vpop.f32.mrb[24].mxu0  ;;  %1228 = vmatpush3.bf16.msra.mxu0 %v1312_v31 }
 0x11f   : > { %v627_v60 = vadd.f32 %v1195_v59, %v1539_v29  ;;  %v618_v61 = vpop.f32.mrb[25].mxu0  ;;  %1229 = vmatprep.subr.bf16.mxu0 %v1382_v28 }
 0x120   : > { %v619_v62 = vadd.f32 %v1539_v29, %v618_v61  ;;  %v1196_v63 = vpop.f32.mrb[26].mxu0  ;;  %1129 = vmatprep.subr.bf16.mxu1 %v692_v58 }
 0x121   : > { %v630_v44 = vadd.f32 %v1196_v63, %v1539_v29  ;;  %v621_v0 = vpop.f32.mrb[27].mxu0  ;;  %1130 = vmatpush3.bf16.msra.mxu1 %v1555_v57  ;;  %v675_v2 = vmax.f32 %v627_v60, 0.0 }
 0x122   : > { %v622_v1 = vadd.f32 %v1539_v29, %v621_v0  ;;  %1131 = vmatprep.subr.bf16.mxu1 %v693_v55  ;;  %v673_v42 = vmax.f32 %v619_v62, 0.0  ;;  %1230 = vmatpush3.bf16.msra.mxu0 %v1313_v32 }
 0x123   : > { %v676_v3 = vmax.f32 %v630_v44, 0.0  ;;  %1231 = vmatprep.subr.bf16.mxu0 %v1382_v28 }
 0x124   : > { %v674_v4 = vmax.f32 %v622_v1, 0.0 }
 0x125   : > { %v695_v5 = vpack.c.bf16 %v676_v3, %v675_v2  ;;  %1132 = vmatpush3.bf16.msra.mxu1 %v1553_v56 }
 0x126   : > { %v694_v8 = vpack.c.bf16 %v674_v4, %v673_v42  ;;  %v1199_v9 = vpop.f32.mrb[28].mxu0  ;;  %1232 = vmatpush3.bf16.msra.mxu0 %v1314_v33 }
 0x127   : > { %v643_v10 = vadd.f32 %v1199_v9, %v1539_v29  ;;  %v634_v11 = vpop.f32.mrb[29].mxu0  ;;  %1233 = vmatprep.subr.bf16.mxu0 %v1382_v28 }
 0x128   : > { %v635_v12 = vadd.f32 %v1539_v29, %v634_v11  ;;  %v1200_v13 = vpop.f32.mrb[30].mxu0  ;;  %1133 = vmatprep.subr.bf16.mxu1 %v694_v8 }
 0x129   : > { %v646_v57 = vadd.f32 %v1200_v13, %v1539_v29  ;;  %v637_v14 = vpop.f32.mrb[31].mxu0  ;;  %1134 = vmatpush3.bf16.msra.mxu1 %v1563_v7  ;;  %v679_v16 = vmax.f32 %v643_v10, 0.0  ;;  %v1301_v7 = vld [vmem:[%s1722_s4] sm:$0xff]  }
 0x12a   : > { %v638_v15 = vadd.f32 %v1539_v29, %v637_v14  ;;  %1135 = vmatprep.subr.bf16.mxu1 %v695_v5  ;;  %v677_v56 = vmax.f32 %v635_v12, 0.0  ;;  %v1302_v29 = vld [vmem:[%s1722_s4 + $0x8] sm:$0xff]   ;;  %1234 = vmatpush3.bf16.msra.mxu0 %v1315_v34 }
 0x12b   : > { %v680_v17 = vmax.f32 %v646_v57, 0.0  ;;  %1235 = vmatprep.subr.bf16.mxu0 %v1382_v28 }
 0x12c   : > { %v678_v18 = vmax.f32 %v638_v15, 0.0 }
 0x12d   : > { %v697_v19 = vpack.c.bf16 %v680_v17, %v679_v16  ;;  %1136 = vmatpush3.bf16.msra.mxu1 %v1561_v6  ;;  %v1303_v6 = vld [vmem:[%s1722_s4 + $0x10] sm:$0xff]  }
 0x12e   : > { %v696_v22 = vpack.c.bf16 %v678_v18, %v677_v56  ;;  %1236 = vmatpush3.bf16.msra.mxu0 %v1316_v35 }
 0x130   : > { %1137 = vmatprep.subr.bf16.mxu1 %v696_v22 }
 0x131   : > { %1138 = vmatpush3.bf16.msra.mxu1 %v1571_v21  ;;  %v1308_v21 = vld [vmem:[%s1722_s4 + $0x38] sm:$0xff]  }
 0x132   : > { %1139 = vmatprep.subr.bf16.mxu1 %v697_v19 }
 0x135   : > { %1140 = vmatpush3.bf16.msra.mxu1 %v1569_v20  ;;  %v1307_v20 = vld [vmem:[%s1722_s4 + $0x30] sm:$0xff]  }
 0x136   : > { %1201 = vmatprep.subr.bf16.mxu1 %v1382_v28 }
 0x138   : > { %756 = vmatmul.mubr.bf16.vlgmr.msra.gmra.mrb[0].mxu1 %v713_v27  ;;  %v1306_v27 = vld [vmem:[%s1722_s4 + $0x28] sm:$0xff]  }
 0x139   : > { %1202 = vmatpush3.bf16.msra.mxu1 %v1301_v7  ;;  %1217 = vmatprep.mubr.msk.bf16.mxu1 %vm1383_vm1, %v1382_v28 }
 0x13a   : > { %1203 = vmatprep.subr.bf16.mxu1 %v1382_v28 }
 0x13d   : > { %1204 = vmatpush3.bf16.msra.mxu1 %v1302_v29 }
 0x13e   : > { %1205 = vmatprep.subr.bf16.mxu1 %v1382_v28 }
 0x141   : > { %1206 = vmatpush3.bf16.msra.mxu1 %v1303_v6 }
 0x142   : > { %1207 = vmatprep.subr.bf16.mxu1 %v1382_v28 }
 0x145   : > { %1208 = vmatpush3.bf16.msra.mxu1 %v1304_v23 }
 0x146   : > { %1209 = vmatprep.subr.bf16.mxu1 %v1382_v28 }
 0x149   : > { %1210 = vmatpush3.bf16.msra.mxu1 %v1305_v25 }
 0x14a   : > { %1211 = vmatprep.subr.bf16.mxu1 %v1382_v28 }
 0x14d   : > { %1212 = vmatpush3.bf16.msra.mxu1 %v1306_v27 }
 0x14e   : > { %1213 = vmatprep.subr.bf16.mxu1 %v1382_v28 }
 0x151   : > { %1214 = vmatpush3.bf16.msra.mxu1 %v1307_v20 }
 0x152   : > { %1215 = vmatprep.subr.bf16.mxu1 %v1382_v28 }
 0x155   : > { %1216 = vmatpush3.bf16.msra.mxu1 %v1308_v21 }
 0x20b   : > { %v1141_v36 = vpop.f32.mrb[0].mxu1 }
 0x20c   : > { %v1142_v37 = vpop.f32.mrb[1].mxu1 }
 0x20d   : > { %v1143_v38 = vadd.f32 %v1142_v37, %v1141_v36  ;;  %v1144_v39 = vpop.f32.mrb[2].mxu1 }
 0x20e   : > { %v1145_v40 = vpop.f32.mrb[3].mxu1 }
 0x20f   : > { %v763_v41 = vpack.c.bf16 %v1143_v38, %v1143_v38 }
 0x211   : > { %1218 = vmatmul.mubr.bf16.vlgmr.msra.gmra.mrb[4].mxu1 %v763_v41 }
 0x2e4   : > { %v863_v45 = vpop.f32.mrb[4].mxu1 }
 0x2e5   : > { %v864_v46 = vadd.f32 %v863_v45, %v780_v43  ;;  %v1219_v47 = vpop.f32.mrb[5].mxu1 }
 0x2e6   : > { %v866_v48 = vpop.f32.mrb[6].mxu1 }
 0x2e7   : > { %v869_v49 = vmax.f32 %v864_v46, 0.0  ;;  %v1220_v28 = vpop.f32.mrb[7].mxu1 }
 0x2e9   : > { %v870_v50 = vpack.c.bf16 %v869_v49, %v869_v49 }
 0x2eb   : > { %1238 = vmatmul.mubr.bf16.vlgmr.msra.gmra.mrb[32].mxu0 %v870_v50 }
 0x3be   : > { %v970_v52 = vpop.f32.mrb[32].mxu0 }
 0x3bf   : > { %v971_v53 = vadd.f32 %v970_v52, %v887_v51  ;;  %v1239_v54 = vpop.f32.mrb[33].mxu0 }
 0x3c0   : > { %v973_v55 = vpop.f32.mrb[34].mxu0 }
 0x3c1   : > { %976 = vst [vmem:[%s297_s13] sm:$0x1] %v971_v53  ;;  %v1240_v58 = vpop.f32.mrb[35].mxu0 }
 0x3c2   : > { %1330 = shalt.err (!%p1327_p3)
}
 0x3c3   : > { %s1331_s25 = scalar_lea.hbm %s1676_s20, 16  ;;  %s1335_s12 = scalar_lea.hbm %s1726_s8, 32 }
 0x3c4   : > { %p1332_p4 = scmp.ne.s32.totalorder %s1676_s20, %s1331_s25  ;;  %p1336_p9 = scmp.lt.u32.totalorder %s1676_s20, %s1726_s8 }
 0x3c5   : > { %p1337_p10 = scmp.lt.u32.totalorder %s1335_s12, %s1331_s25  ;;  %p1339_p12 = scmp.lt.u32.totalorder %s1331_s25, %s1676_s20 }
 0x3c6   : > { %p1333_p7 = pnand %p1332_p4, %p1468_p5 }
 0x3c7   : > { %p1338_p11 = por %p1337_p10, %p1336_p9 }
 0x3c8   : > { %p1334_p8 = pneg %p1333_p7 }
 0x3c9   : > { %p1340_p13 = por %p1339_p12, %p1338_p11 }
 0x3cb   : > { %p1341_p0 = pnand %p1340_p13, %p1334_p8 }
 0x3cd   : > { %1344 = shalt.err (!%p1341_p0)
}
 0x3ce   : > { %1241 = dma.vmem_to_hbm [thread:$0]  (%p1468_p5), %s1678_s17, 16, %s1676_s20, %s978_s21  }
 0x3cf PF: > { %p1247_p1 = scmp.ge.s32.totalorder %s1379_s30, 2  ;;  %s1002_s19 = sand.u32 1, %s1367_s27  }
 0x3d0   : > { %s1003_s9 = scalar_lea.sflag [#allocation3], %s1002_s19 }
 0x3d1   : > { %p1244_p2 = pnand %p1247_p1, %p1472_p6 }
 0x3d3   : > { %1362 = dma.done.wait (!%p1244_p2), %s1003_s9, 16  }
 0x3d4   : > { %1364 = vsyncadd (!%p1244_p2), %s1003_s9, 4294967280  ;;  %p18_p3 = scmp.ge.s32.totalorder %s1455_s11, 4   ;;  %s1729_s27 = smov %s1371_s28 }
 0x3d5   : > { %s1730_s28 = smov %s1375_s29  ;;  %s1731_s29 = smov %s1466_s14 }
 0x3d6   : > { %s1732_s30 = smov %s1455_s11  ;;  %20 = sbr.rel (!%p18_p3) target bundleno = 3 (0x3), region = 87 }
 0x3dd   :  { %1007 = vsyncpa [#allocation3], 1 }
 0x3de   :  { %1009 = vsyncpa [#allocation3 + $0x1], 1 }

</bundles_post_ra>
